<compile_context>
chip_gen: v7x
topology: tpu7x:2x2x1
jax: 0.10.0
libtpu: 0.0.40
codegen_flags: <defaults>
</compile_context>

<pallas_src>
import jax
import jax.numpy as jnp
from jax.experimental import pallas as pl
from jax.experimental.pallas import tpu as pltpu


def _make_game_kernel(eps: float, vocab: int, batch: int, num_tiles: int):
    keep = float(1.0 - eps)          # (1-eps) scale on the true symbol
    mix = float(eps) / float(vocab)  # uniform leak per symbol
    inv_v = 1.0 / float(vocab)
    inv_b = 1.0 / float(batch)
    last = num_tiles - 1

    def kernel(x_ref, w_ref, b_ref, msg_ref, recv_ref, loss_ref):
        i = pl.program_id(0)

        x = x_ref[...]                                  # (TILE_B, D) f32
        w = w_ref[...]                                  # (D, V)     f32, resident
        b = b_ref[...]                                  # (1, V)     f32, resident

        # --- sender: Linear + LogSoftmax(dim=1) (max-shifted, numerically stable) ---
        logits = jnp.dot(x, w, preferred_element_type=jnp.float32) + b   # (TILE_B, V)
        m = jnp.max(logits, axis=-1, keepdims=True)
        shifted = logits - m
        e = jnp.exp(shifted)                             # reused for probs below
        s = jnp.sum(e, axis=-1, keepdims=True)
        message = shifted - jnp.log(s)                   # exact log-probs (logged output)
        probs = e * pl.reciprocal(s, approx=True)        # EUP vrcp, own VLIW slot

        # --- noisy channel folded algebraically (probs rows sum to 1) ---
        # probs @ [(1-eps)I + eps/V * ones] == (1-eps)*probs + eps/V
        receiver_output = keep * probs + mix             # receiver is identity

        # --- loss: per-sample MSE vs sender_input, batch-mean fused in-kernel ---
        diff = x - receiver_output
        tile_loss_sum = jnp.sum(diff * diff) * inv_v     # sum over tile of mean(dim=1)

        msg_ref[...] = message
        recv_ref[...] = receiver_output

        @pl.when(i == 0)
        def _():
            loss_ref[0, 0] = jnp.float32(0.0)

        loss_ref[0, 0] += tile_loss_sum

        @pl.when(i == last)
        def _():
            loss_ref[0, 0] = loss_ref[0, 0] * jnp.float32(inv_b)

    return kernel


def noisy_symbol_game_gs(x, w, b, eps, tile_b=None):
    """Runs the game forward. Returns (mean_loss, interaction dict)."""
    B, D = x.shape
    V = w.shape[1]
    assert D == V, "MSE loss requires sender_input dim == receiver_output dim"

    if tile_b is None:
        # multiple of 8 sublanes; cap so double-buffered tiles stay well under VMEM
        # (re-derive for v7x's smaller 64 MiB VMEM if V grows large).
        tile_b = min(B, 256)
    assert B % tile_b == 0, "batch must be divisible by the batch tile"
    num_tiles = B // tile_b

    kernel = _make_game_kernel(eps, V, B, num_tiles)

    message, receiver_output, loss_acc = pl.pallas_call(
        kernel,
        grid=(num_tiles,),
        out_shape=(
            jax.ShapeDtypeStruct((B, V), jnp.float32),   # message (log-probs)
            jax.ShapeDtypeStruct((B, V), jnp.float32),   # receiver_output
            jax.ShapeDtypeStruct((1, 1), jnp.float32),   # batch-mean loss (scalar)
        ),
        in_specs=[
            pl.BlockSpec((tile_b, D), lambda i: (i, 0)),   # x: streamed per batch tile
            pl.BlockSpec((D, V), lambda i: (0, 0)),        # W: resident across grid
            pl.BlockSpec((1, V), lambda i: (0, 0)),        # b: resident across grid
        ],
        out_specs=(
            pl.BlockSpec((tile_b, V), lambda i: (i, 0)),
            pl.BlockSpec((tile_b, V), lambda i: (i, 0)),
            pl.BlockSpec((1, 1), lambda i: (0, 0), memory_space=pltpu.SMEM),
        ),
        # Loss is accumulated across the batch grid axis -> must be "arbitrary".
        # (Trade-off vs. megacore-parallel batch sharding on v7x; at these sizes the
        #  fused scalar reduction is the bigger win.)
        compiler_params=pltpu.CompilerParams(
            dimension_semantics=("arbitrary",),
        ),
    )(x, w, b.reshape(1, V))

    loss_mean = loss_acc[0, 0]

    # Interaction record (mirrors LoggingStrategy.filtered_interaction; detach == stop_gradient)
    interaction = {
        "sender_input": x,
        "receiver_input": None,
        "labels": None,
        "receiver_output": jax.lax.stop_gradient(receiver_output),
        "message": jax.lax.stop_gradient(message),
        "message_length": jnp.ones((B,), jnp.float32),
        "aux": {},
    }
    return loss_mean, interaction


if __name__ == "__main__":
    B, D = 8, 32            # batch, feature dim == vocab size
    V = D
    eps = 0.1               # channel noise level

    key = jax.random.PRNGKey(0)
    kx, kw, kb = jax.random.split(key, 3)

    x = jax.random.normal(kx, (B, D), dtype=jnp.float32)
    # deterministic parameter init (synthetic; no checkpoint load)
    w = jax.random.normal(kw, (D, V), dtype=jnp.float32) * (1.0 / jnp.sqrt(D))
    b = jax.random.normal(kb, (V,), dtype=jnp.float32) * 0.01

    loss, interaction = noisy_symbol_game_gs(x, w, b, eps)
    jax.block_until_ready(loss)
    jax.block_until_ready(interaction["message"])

    assert loss.shape == ()
    assert interaction["message"].shape == (B, V)
    assert interaction["receiver_output"].shape == (B, V)
    assert bool(loss > 0)
    # messages are valid log-probs: rows of exp(message) sum to ~1
    assert bool(jnp.max(jnp.abs(jnp.sum(jnp.exp(interaction["message"]), axis=-1) - 1.0)) < 1e-4)

    print("KERNEL_OK")
</pallas_src>

<mosaic_0001>
module attributes {stable_mosaic.version = 11 : i64} {
  func.func @kernel(%arg0: i32, %arg1: memref<8x32xf32, #tpu.memory_space<vmem>>, %arg2: memref<32x32xf32, #tpu.memory_space<vmem>>, %arg3: memref<1x32xf32, #tpu.memory_space<vmem>>, %arg4: memref<8x32xf32, #tpu.memory_space<vmem>>, %arg5: memref<8x32xf32, #tpu.memory_space<vmem>>, %arg6: memref<1x1xf32, #tpu.memory_space<smem>>) attributes {dimension_semantics = [#tpu.dimension_semantics<arbitrary>], iteration_bounds = array<i64: 1>, scalar_prefetch = 0 : i64, scratch_operands = 0 : i64, tpu.core_type = #tpu.core_type<tc>, window_params = [{transform_indices = @transform_0, window_bounds = array<i64: 8, 32>}, {pipeline_mode = #tpu.pipeline_mode<synchronous>, transform_indices = @transform_1, window_bounds = array<i64: 32, 32>}, {pipeline_mode = #tpu.pipeline_mode<synchronous>, transform_indices = @transform_2, window_bounds = array<i64: 1, 32>}, {transform_indices = @transform_3, window_bounds = array<i64: 8, 32>}, {transform_indices = @transform_4, window_bounds = array<i64: 8, 32>}, {transform_indices = @transform_5, window_bounds = array<i64: 1, 1>}]} {
    %c0 = arith.constant 0 : index
    %c0_0 = arith.constant 0 : index
    %0 = vector.load %arg1[%c0, %c0_0] : memref<8x32xf32, #tpu.memory_space<vmem>>, vector<8x32xf32>
    %c0_1 = arith.constant 0 : index
    %c0_2 = arith.constant 0 : index
    %1 = vector.load %arg2[%c0_1, %c0_2] : memref<32x32xf32, #tpu.memory_space<vmem>>, vector<32x32xf32>
    %c0_3 = arith.constant 0 : index
    %c0_4 = arith.constant 0 : index
    %2 = vector.load %arg3[%c0_3, %c0_4] : memref<1x32xf32, #tpu.memory_space<vmem>>, vector<1x32xf32>
    %cst = arith.constant dense<0.000000e+00> : vector<8x32xf32>
    %3 = tpu.matmul %0, %1, %cst {dimension_numbers = #tpu.dot_dimension_numbers<[1], [0], [0], [1], [0, 0, 1, 1], [], []>} : vector<8x32xf32>, vector<32x32xf32>, vector<8x32xf32> -> vector<8x32xf32>
    %4 = vector.broadcast %2 : vector<1x32xf32> to vector<8x32xf32>
    %5 = arith.addf %3, %4 : vector<8x32xf32>
    %cst_5 = arith.constant dense<0xFF800000> : vector<8xf32>
    %6 = vector.multi_reduction <maximumf>, %5, %cst_5 [1] : vector<8x32xf32> to vector<8xf32>
    %7 = vector.shape_cast %6 : vector<8xf32> to vector<8x1xf32>
    %8 = vector.broadcast %7 : vector<8x1xf32> to vector<8x32xf32>
    %9 = arith.subf %5, %8 : vector<8x32xf32>
    %10 = math.exp %9 : vector<8x32xf32>
    %cst_6 = arith.constant dense<0.000000e+00> : vector<8xf32>
    %11 = vector.multi_reduction <add>, %10, %cst_6 [1] : vector<8x32xf32> to vector<8xf32>
    %12 = vector.shape_cast %11 : vector<8xf32> to vector<8x1xf32>
    %13 = math.log %12 : vector<8x1xf32>
    %14 = vector.broadcast %13 : vector<8x1xf32> to vector<8x32xf32>
    %15 = arith.subf %9, %14 : vector<8x32xf32>
    %16 = tpu.reciprocal %12 {approx = true} : vector<8x1xf32> -> vector<8x1xf32>
    %17 = vector.broadcast %16 : vector<8x1xf32> to vector<8x32xf32>
    %18 = arith.mulf %10, %17 : vector<8x32xf32>
    %cst_7 = arith.constant 0.899999976 : f32
    %19 = vector.broadcast %cst_7 : f32 to vector<8x32xf32>
    %20 = arith.mulf %19, %18 : vector<8x32xf32>
    %cst_8 = arith.constant 3.125000e-03 : f32
    %21 = vector.broadcast %cst_8 : f32 to vector<8x32xf32>
    %22 = arith.addf %20, %21 : vector<8x32xf32>
    %23 = arith.subf %0, %22 : vector<8x32xf32>
    %24 = arith.mulf %23, %23 : vector<8x32xf32>
    %25 = vector.shape_cast %24 : vector<8x32xf32> to vector<1x8x32xf32>
    %cst_9 = arith.constant dense<0.000000e+00> : vector<1xf32>
    %26 = vector.multi_reduction <add>, %25, %cst_9 [1, 2] : vector<1x8x32xf32> to vector<1xf32>
    %27 = vector.shape_cast %26 : vector<1xf32> to vector<1x1x1xf32>
    %28 = vector.extract %27[0, 0, 0] : f32 from vector<1x1x1xf32>
    %cst_10 = arith.constant 3.125000e-02 : f32
    %29 = arith.mulf %28, %cst_10 : f32
    %c0_11 = arith.constant 0 : index
    %c0_12 = arith.constant 0 : index
    %30 = vector.load %arg4[%c0_11, %c0_12] : memref<8x32xf32, #tpu.memory_space<vmem>>, vector<8x32xf32>
    tpu.vector_store %arg4[%c0_11, %c0_12], %15 {strides = array<i32>} : memref<8x32xf32, #tpu.memory_space<vmem>>, vector<8x32xf32>,
    %c0_13 = arith.constant 0 : index
    %c0_14 = arith.constant 0 : index
    %31 = vector.load %arg5[%c0_13, %c0_14] : memref<8x32xf32, #tpu.memory_space<vmem>>, vector<8x32xf32>
    tpu.vector_store %arg5[%c0_13, %c0_14], %22 {strides = array<i32>} : memref<8x32xf32, #tpu.memory_space<vmem>>, vector<8x32xf32>,
    %c0_i32 = arith.constant 0 : i32
    %32 = arith.cmpi eq, %arg0, %c0_i32 : i32
    %33 = arith.extui %32 : i1 to i32
    %c0_i32_15 = arith.constant 0 : i32
    %34 = arith.cmpi ne, %33, %c0_i32_15 : i32
    scf.if %34 {
      %cst_22 = arith.constant 0.000000e+00 : f32
      %c0_23 = arith.constant 0 : index
      %c0_24 = arith.constant 0 : index
      %41 = memref.load %arg6[%c0_23, %c0_24] : memref<1x1xf32, #tpu.memory_space<smem>>
      memref.store %cst_22, %arg6[%c0_23, %c0_24] : memref<1x1xf32, #tpu.memory_space<smem>>
    } else {
    }
    %c0_16 = arith.constant 0 : index
    %c0_17 = arith.constant 0 : index
    %35 = memref.load %arg6[%c0_16, %c0_17] : memref<1x1xf32, #tpu.memory_space<smem>>
    %36 = arith.addf %35, %29 : f32
    %c0_18 = arith.constant 0 : index
    %c0_19 = arith.constant 0 : index
    %37 = memref.load %arg6[%c0_18, %c0_19] : memref<1x1xf32, #tpu.memory_space<smem>>
    memref.store %36, %arg6[%c0_18, %c0_19] : memref<1x1xf32, #tpu.memory_space<smem>>
    %c0_i32_20 = arith.constant 0 : i32
    %38 = arith.cmpi eq, %arg0, %c0_i32_20 : i32
    %39 = arith.extui %38 : i1 to i32
    %c0_i32_21 = arith.constant 0 : i32
    %40 = arith.cmpi ne, %39, %c0_i32_21 : i32
    scf.if %40 {
      %c0_22 = arith.constant 0 : index
      %c0_23 = arith.constant 0 : index
      %41 = memref.load %arg6[%c0_22, %c0_23] : memref<1x1xf32, #tpu.memory_space<smem>>
      %cst_24 = arith.constant 1.250000e-01 : f32
      %42 = arith.mulf %41, %cst_24 : f32
      %c0_25 = arith.constant 0 : index
      %c0_26 = arith.constant 0 : index
      %43 = memref.load %arg6[%c0_25, %c0_26] : memref<1x1xf32, #tpu.memory_space<smem>>
      memref.store %42, %arg6[%c0_25, %c0_26] : memref<1x1xf32, #tpu.memory_space<smem>>
    } else {
    }
    return
  }
  func.func @transform_0(%arg0: i32) -> (i32, i32) {
    %c0_i32 = arith.constant 0 : i32
    %c0_i32_0 = arith.constant 0 : i32
    return %arg0, %c0_i32 : i32, i32
  }
  func.func @transform_1(%arg0: i32) -> (i32, i32) {
    %c0_i32 = arith.constant 0 : i32
    %c0_i32_0 = arith.constant 0 : i32
    %c0_i32_1 = arith.constant 0 : i32
    return %c0_i32, %c0_i32_0 : i32, i32
  }
  func.func @transform_2(%arg0: i32) -> (i32, i32) {
    %c0_i32 = arith.constant 0 : i32
    %c0_i32_0 = arith.constant 0 : i32
    %c0_i32_1 = arith.constant 0 : i32
    return %c0_i32, %c0_i32_0 : i32, i32
  }
  func.func @transform_3(%arg0: i32) -> (i32, i32) {
    %c0_i32 = arith.constant 0 : i32
    %c0_i32_0 = arith.constant 0 : i32
    return %arg0, %c0_i32 : i32, i32
  }
  func.func @transform_4(%arg0: i32) -> (i32, i32) {
    %c0_i32 = arith.constant 0 : i32
    %c0_i32_0 = arith.constant 0 : i32
    return %arg0, %c0_i32 : i32, i32
  }
  func.func @transform_5(%arg0: i32) -> (i32, i32) {
    %c0_i32 = arith.constant 0 : i32
    %c0_i32_0 = arith.constant 0 : i32
    %c0_i32_1 = arith.constant 0 : i32
    return %c0_i32, %c0_i32_0 : i32, i32
  }
}

</mosaic_0001>

<bundles_post_ra>
// kernel: tpu_custom_call.1
= control target key start
LH: loop header
LB: loop body
LE: loop exit
PB: predicated region body
PF: predicated region fallthrough
CT: control target
= control target key end

     0   :  { %11 = vsyncpa [#allocation3], 0  ;;  %s489_s0 = inlined_call_operand.hbm [shape: f32[8,32], index: 0, kind: input, shape index: {}]   ;;  %s490_s1 = inlined_call_operand.hbm [shape: f32[32,32], index: 1, kind: input, shape index: {}]   ;;  %s491_s2 = inlined_call_operand.vmem [shape: f32[1,32], index: 2, kind: input, shape index: {}]   ;;  %s492_s3 = inlined_call_operand.hbm [shape: f32[8,32], index: 3, kind: output, shape index: {0}]   ;;  %s493_s4 = inlined_call_operand.hbm [shape: f32[8,32], index: 4, kind: output, shape index: {1}]   ;;  %s494_s5 = inlined_call_operand.hbm [shape: f32[1,1], index: 5, kind: output, shape index: {2}]  }
   0x1   :  { %12 = vsyncpa [#allocation7], 0 }
   0x2   :  { %13 = vsyncpa [#allocation4], 0 }
   0x3   :  { %14 = vsyncpa [#allocation10], 0 }
   0x4   :  { %15 = vsyncpa [#allocation5], 0  ;;  %s373_s18 = smov [#allocation2]   ;;  %s374_s20 = smov [#allocation6]  }
   0x5   :  { %s22_s19 = sshll.u32 %s373_s18, 4  ;;  %s31_s21 = sshll.u32 %s374_s20, 4  ;;  %s23_s19 = int_to_ptr.vmem [resolvable:$true] %s22_s19  ;;  %s413_s21 = int_to_ptr.vmem [resolvable:$true] %s31_s21 }
   0x6   :  { %s265_s24 = scalar_lea.hbm %s489_s0, 128 }
   0x7   :  { %p266_p0 = scmp.ne.s32.totalorder %s489_s0, %s265_s24  ;;  %p269_p1 = scmp.lt.u32.totalorder %s265_s24, %s489_s0 }
   0x9   :  { %p271_p2 = pnand %p269_p1, %p266_p0 }
   0xb   :  { %274 = shalt.err (!%p271_p2)
}
   0xc   :  { %s275_s29 = scalar_lea.vmem %s23_s19, 128  ;;  %p280_p4 = scmp.lt.s32.totalorder %s23_s19, %s23_s19 }
   0xd   :  { %p276_p3 = scmp.ne.s32.totalorder %s23_s19, %s275_s29  ;;  %p281_p5 = scmp.lt.s32.totalorder %s275_s29, %s275_s29 }
   0xf   :  { %p282_p6 = por %p281_p5, %p280_p4 }
  0x11   :  { %p283_p7 = pnand %p282_p6, %p276_p3 }
  0x13   :  { %286 = shalt.err (!%p283_p7)
}
  0x14   :  { %25 = dma.hbm_to_vmem [thread:$0]  %s489_s0, 128, %s23_s19, [#allocation3]  }
  0x15   :  { %s287_s9 = scalar_lea.hbm %s490_s1, 512 }
  0x16   :  { %p288_p8 = scmp.ne.s32.totalorder %s490_s1, %s287_s9  ;;  %p291_p9 = scmp.lt.u32.totalorder %s287_s9, %s490_s1 }
  0x18   :  { %p293_p10 = pnand %p291_p9, %p288_p8 }
  0x1a   :  { %296 = shalt.err (!%p293_p10)
}
  0x1b   :  { %s297_s14 = scalar_lea.vmem %s413_s21, 512  ;;  %p302_p12 = scmp.lt.s32.totalorder %s413_s21, %s413_s21 }
  0x1c   :  { %p298_p11 = scmp.ne.s32.totalorder %s413_s21, %s297_s14  ;;  %p303_p13 = scmp.lt.s32.totalorder %s297_s14, %s297_s14 }
  0x1e   :  { %p304_p0 = por %p303_p13, %p302_p12 }
  0x20   :  { %p305_p1 = pnand %p304_p0, %p298_p11 }
  0x22   :  { %308 = shalt.err (!%p305_p1)
}
  0x23   :  { %s375_s0 = smov 128   ;;  %s376_s15 = smov 8  }
  0x24   :  { %37 = dma.hbm_to_vmem [thread:$0]  %s490_s1, 512, %s413_s21, [#allocation7], %s375_s0, %s375_s0, %s376_s15  }
  0x25   :  { %363 = dma.done.wait [#allocation3], 128  }
  0x26   :  { %364 = vsyncadd [#allocation3], 4294967168 }
  0x27   :  { %365 = dma.done.wait [#allocation7], 512  }
  0x28   :  { %366 = vsyncadd [#allocation7], 4294966784  ;;  %v377_v0 = vmov 0.0|0.0   ;;  %vm378_vm0 = vmmov 0   ;;  %v379_v1 = vmov 0.0   ;;  %v47_v2 = vld [vmem:[#allocation6] sm:$0xff] }
  0x29   :  { %240 = vmatprep.subr.bf16.mxu0 %v377_v0  ;;  %237 = vmatprep.mubr.msk.f32.mxu0 %vm378_vm0, %v379_v1  ;;  %v48_v3 = vld [vmem:[#allocation6 + $0x8] sm:$0xff]  ;;  %v49_v4 = vld [vmem:[#allocation6 + $0x10] sm:$0xff]  ;;  %v50_v6 = vld [vmem:[#allocation6 + $0x18] sm:$0xff]  ;;  %vm58_vm1 = vcmask 261120   ;;  %s381_s20 = smov [#allocation9]  }
  0x2a   :  { %v241_v5 = vpack.c.bf16 %v48_v3, %v47_v2  ;;  %v244_v7 = vpack.c.bf16 %v50_v6, %v49_v4  ;;  %v46_v8 = vld [vmem:[#allocation2] sm:$0xff]  ;;  %s195_s21 = sshll.u32 %s381_s20, 4  ;;  %s196_s21 = int_to_ptr.vmem [resolvable:$true] %s195_s21 }
  0x2b   :  { %v222_v9 = vld [vmem:[%s491_s2] ss:$0 sm:$0xff]  ;;  %s380_s2 = smov [#allocation8]  }
  0x2c   :  { %242 = vmatpush3.bf16.msra.mxu0 %v241_v5  ;;  %s185_s19 = sshll.u32 %s380_s2, 4  ;;  %s186_s19 = int_to_ptr.vmem [resolvable:$true] %s185_s19 }
  0x2d   :  { %243 = vmatprep.subr.bf16.mxu0 %v377_v0  ;;  %s309_s22 = scalar_lea.vmem %s186_s19, 128  ;;  %p314_p3 = scmp.lt.s32.totalorder %s186_s19, %s186_s19 }
  0x2e   :  { %p310_p2 = scmp.ne.s32.totalorder %s186_s19, %s309_s22  ;;  %p315_p4 = scmp.lt.s32.totalorder %s309_s22, %s309_s22 }
  0x30   :  { %245 = vmatpush3.bf16.msra.mxu0 %v244_v7  ;;  %p316_p5 = por %p315_p4, %p314_p3 }
  0x32   :  { %p317_p6 = pnand %p316_p5, %p310_p2 }
  0x33   :  { %238 = vmatmul.mubr.msk.f32.vlgmr.msra.gmra.mrb[0].mxu0 %vm58_vm1, %v46_v8 }
 0x106   :  { %v128_v10 = vpop.f32.mrb[0].mxu0 }
 0x107   :  { %v129_v11 = vadd.f32 %v222_v9, %v128_v10  ;;  %v239_v12 = vpop.f32.mrb[1].mxu0 }
 0x109   :  { %v132_v13 = vsel %vm58_vm1, %v129_v11, -inf }
 0x10a   :  { %133 = vmax.xlane.f32.xlu0 %v132_v13 }
 0x197   :  { %v134_v14 = vpop.xlane.xlu0 %133 }
 0x198   :  { %v135_v15 = vsub.f32 %v129_v11, %v134_v14 }
 0x19a   :  { %v136_v16 = vmul.f32 1.442695, %v135_v15 }
 0x19c   :  { %259 = vpow2.f32 %v136_v16 }
 0x1a6   :  { %v260_v17 = vpop.eup %259 }
 0x1a7   :  { %v138_v18 = vsel %vm58_vm1, %v260_v17, 0.0 }
 0x1a8   :  { %139 = vadd.xlane.f32.xlu0 %v138_v18 }
 0x235   :  { %v140_v19 = vpop.xlane.xlu0 %139 }
 0x236   :  { %261 = vlog2.f32 %v140_v19 }
 0x237   :  { %263 = vrcp.f32 %v140_v19 }
 0x240   :  { %v262_v20 = vpop.eup %261 }
 0x241   :  { %v264_v21 = vpop.eup %263  ;;  %v142_v22 = vmul.f32 0.6931472, %v262_v20 }
 0x242   :  { %v145_v23 = vmul.f32 %v264_v21, %v260_v17 }
 0x243   :  { %v143_v24 = vsub.f32 %v135_v15, %v142_v22 }
 0x244   :  { %v146_v25 = vmul.f32 0.9, %v145_v23 }
 0x245   :  { %161 = vst.msk [vmem:[#allocation8] sm:$0xff] %vm58_vm1, %v143_v24 }
 0x246   :  { %v147_v26 = vadd.f32 0.003125, %v146_v25 }
 0x248   :  { %v148_v27 = vsub.f32 %v46_v8, %v147_v26  ;;  %162 = vst.msk [vmem:[#allocation9] sm:$0xff] %vm58_vm1, %v147_v26 }
 0x24a   :  { %v149_v28 = vmul.f32 %v148_v27, %v148_v27 }
 0x24c   :  { %v150_v29 = vsel %vm58_vm1, %v149_v28, 0.0 }
 0x24d   :  { %151 = vadd.xlane.f32.xlu1 %v150_v29 }
 0x24e   :  { %320 = shalt.err (!%p317_p6)
}
 0x24f   :  { %s321_s25 = scalar_lea.hbm %s492_s3, 128 }
 0x250   :  { %p322_p7 = scmp.ne.s32.totalorder %s492_s3, %s321_s25  ;;  %p325_p8 = scmp.lt.u32.totalorder %s321_s25, %s492_s3 }
 0x252   :  { %p327_p9 = pnand %p325_p8, %p322_p7 }
 0x254   :  { %330 = shalt.err (!%p327_p9)
}
 0x255   :  { %188 = dma.vmem_to_hbm [thread:$0]  %s186_s19, 128, %s492_s3, [#allocation4]  }
 0x256   :  { %s331_s7 = scalar_lea.vmem %s196_s21, 128  ;;  %p336_p11 = scmp.lt.s32.totalorder %s196_s21, %s196_s21 }
 0x257   :  { %p332_p10 = scmp.ne.s32.totalorder %s196_s21, %s331_s7  ;;  %p337_p12 = scmp.lt.s32.totalorder %s331_s7, %s331_s7 }
 0x259   :  { %p338_p13 = por %p337_p12, %p336_p11 }
 0x25b   :  { %p339_p0 = pnand %p338_p13, %p332_p10 }
 0x25d   :  { %342 = shalt.err (!%p339_p0)
}
 0x25e   :  { %s343_s10 = scalar_lea.hbm %s493_s4, 128 }
 0x25f   :  { %p344_p1 = scmp.ne.s32.totalorder %s493_s4, %s343_s10  ;;  %p347_p2 = scmp.lt.u32.totalorder %s343_s10, %s493_s4 }
 0x261   :  { %p349_p3 = pnand %p347_p2, %p344_p1 }
 0x263   :  { %352 = shalt.err (!%p349_p3)
}
 0x264   :  { %198 = dma.vmem_to_hbm [thread:$0]  %s196_s21, 128, %s493_s4, [#allocation10]  }
 0x265   :  { %s353_s2 = scalar_lea.hbm %s494_s5, 16 }
 0x266   :  { %p354_p4 = scmp.ne.s32.totalorder %s494_s5, %s353_s2  ;;  %p357_p5 = scmp.lt.u32.totalorder %s353_s2, %s494_s5 }
 0x268   :  { %p359_p6 = pnand %p357_p5, %p354_p4 }
 0x2da   :  { %v152_v30 = vpop.xlane.xlu1 %151 }
 0x2db   :  { %v153_v31 = vrot.slane %v152_v30, 4 }
 0x2dd   :  { %v154_v32 = vadd.f32 %v153_v31, %v152_v30 }
 0x2df   :  { %v155_v33 = vrot.slane %v154_v32, 2 }
 0x2e1   :  { %v156_v34 = vadd.f32 %v155_v33, %v154_v32 }
 0x2e3   :  { %v157_v35 = vrot.slane %v156_v34, 1 }
 0x2e5   :  { %v158_v36 = vadd.f32 %v157_v35, %v156_v34 }
 0x2e7   :  { %246 = vpush %v158_v36 }
 0x318   :  { %s247_s15 = spop %246 }
 0x319   :  { %s160_s16 = smul.f32 0.03125, %s247_s15 }
 0x31b   :  { %s177_s17 = smul.f32 0.125, %s160_s16 }
 0x31d   :  { %178 = sst [smem:[#allocation11]] %s177_s17 }
 0x31e   :  { %362 = shalt.err (!%p359_p6)
}
 0x31f   :  { %s382_s22 = smov [#allocation11]  }
 0x320   :  { %206 = dma.smem_to_hbm %s382_s22, 16, %s494_s5, [#allocation5]  }
 0x321   :  { %367 = dma.done.wait [#allocation4], 128  }
 0x322   :  { %368 = vsyncadd [#allocation4], 4294967168 }
 0x323   :  { %369 = dma.done.wait [#allocation10], 128  }
 0x324   :  { %370 = vsyncadd [#allocation10], 4294967168 }
 0x325   :  { %371 = dma.done.wait [#allocation5], 16  }
 0x326   :  { %372 = vsyncadd [#allocation5], 4294967280 }
 0x327   :  { %216 = sfence }
 0x328   :  { %217 = vsyncpa [#allocation3], 1 }
 0x329   :  { %218 = vsyncpa [#allocation7], 1 }
 0x32a   :  { %219 = vsyncpa [#allocation4], 1 }
 0x32b   :  { %220 = vsyncpa [#allocation10], 1 }
 0x32c   :  { %221 = vsyncpa [#allocation5], 1 }

</bundles_post_ra>
